<compile_context>
chip_gen: v7x
topology: tpu7x:2x2x1
jax: 0.10.0
libtpu: 0.0.40
codegen_flags: <defaults>
</compile_context>

<pallas_src>
import functools

import jax
import jax.numpy as jnp
from jax import lax
from jax.experimental import pallas as pl
from jax.experimental.pallas import tpu as pltpu

# Logical (PyTorch) sizes.
EMBED = 100            # embed_size / embed_dim
H1, H2, OUT = 500, 200, 100
BN_EPS = 1e-5
LEAKY = 0.01           # nn.LeakyReLU default negative_slope

# Lane-aligned (zero-padded) sizes used inside the kernel.  Zero padding keeps
# the math exact while giving the MXU 128-aligned tiles.
EPAD = 128             # embed dim   100 -> 128
H1P, H2P = 512, 256    # hidden dims 500 -> 512, 200 -> 256
OUTP = EPAD            # out_size    100 -> 128 (must equal EPAD for broadcasting)


def _round_up(x, m):
    return ((x + m - 1) // m) * m


# -----------------------------------------------------------------------------
# Fused kernel: one grid step == one batch element (task).
#   1. RelationMetaLearner MLP (bf16 matmuls, f32 accumulation), mean over `few`.
#   2. Closed-form MarginRankingLoss gradient w.r.t. rel -> rel_q = rel - beta*grad.
#   3. EmbeddingLearner scoring of (query ++ negative) with rel_q.
# -----------------------------------------------------------------------------
def fused_kernel(sup_h_ref, sup_t_ref, sng_h_ref, sng_t_ref, qe1_ref, qe2_ref,
                 w1_ref, b1_ref, w2_ref, b2_ref, w3_ref, b3_ref,
                 bns_ref, bnt_ref, out_ref,
                 *, n_total, n_pad, margin, beta, inv_count, ablation):
    f32, bf16 = jnp.float32, jnp.bfloat16

    sup_h = sup_h_ref[...]                     # [few, EPAD] f32
    sup_t = sup_t_ref[...]

    # ---- RelationMetaLearner -------------------------------------------------
    # x = concat([head, tail], -1)  =>  x @ W1 == head @ W1[:E] + tail @ W1[E:]
    def bn_act(y, i, leaky):
        # BatchNorm1d(few), eval mode: per-`few`-channel scale / shift.
        y = y * bns_ref[i] + bnt_ref[i]        # [few, H] * [few, 1] + [few, 1]
        if leaky:
            y = jnp.where(y >= 0.0, y, LEAKY * y)
        # TODO(synk): nn.Dropout is identity in eval mode; training-mode RNG
        # dropout is not implemented here.
        return y

    h = (jnp.dot(sup_h.astype(bf16), w1_ref[:EPAD, :], preferred_element_type=f32)
         + jnp.dot(sup_t.astype(bf16), w1_ref[EPAD:, :], preferred_element_type=f32)
         + b1_ref[...])
    h = bn_act(h, 0, True)                                                  # [few, H1P]
    h = jnp.dot(h.astype(bf16), w2_ref[...], preferred_element_type=f32) + b2_ref[...]
    h = bn_act(h, 1, True)                                                  # [few, H2P]
    h = jnp.dot(h.astype(bf16), w3_ref[...], preferred_element_type=f32) + b3_ref[...]
    h = bn_act(h, 2, False)                                                 # [few, OUTP]
    # Zero the padded output lanes so they never leak into the distance norms.
    lane_ok = lax.broadcasted_iota(jnp.int32, (1, OUTP), 1) < OUT
    h = jnp.where(lane_ok, h, 0.0)
    # torch.mean(x, 1): mean over the `few` axis as a cheap sublane reduce.
    rel = jnp.mean(h, axis=0, keepdims=True)                                # [1, OUTP]

    # ---- meta update: rel_q = rel - beta * d(margin-ranking-loss)/d(rel) -----
    if not ablation:
        dp = sup_h + rel - sup_t                                            # [few, EPAD]
        dn = sng_h_ref[...] + rel - sng_t_ref[...]
        sp = jnp.sum(dp * dp, axis=-1, keepdims=True)                       # [few, 1]
        sn = jnp.sum(dn * dn, axis=-1, keepdims=True)
        inv_p = lax.rsqrt(jnp.maximum(sp, 1e-30))   # safe: no NaN at zero norm (EUP)
        inv_n = lax.rsqrt(jnp.maximum(sn, 1e-30))
        norm_p, norm_n = sp * inv_p, sn * inv_n                             # ||dp||, ||dn||
        # hinge active: margin - (p - n) > 0 with p = -||dp||, n = -||dn||
        active = (margin + norm_p - norm_n) > 0.0
        contrib = jnp.where(active, dp * inv_p - dn * inv_n, 0.0)           # [few, EPAD]
        grad = inv_count * jnp.sum(contrib, axis=0, keepdims=True)          # [1, OUTP]
        rel_q = rel - beta * grad
    else:
        rel_q = rel

    # ---- EmbeddingLearner on (query ++ negative) -----------------------------
    d = qe1_ref[...] + rel_q - qe2_ref[...]                                 # [n_total, EPAD]
    dd = d * d
    # Row of squared distances in lane-major layout via a trans-b MXU dot.
    ones_row = jnp.ones((1, EPAD), f32)
    sq_row = lax.dot_general(ones_row, dd, (((1,), (1,)), ((), ())),
                             preferred_element_type=f32)                    # [1, n_total]
    score_row = -jnp.sqrt(sq_row)
    if n_pad > n_total:                        # lane-dense (128-multiple) store
        score_row = jnp.concatenate(
            [score_row, jnp.zeros((1, n_pad - n_total), f32)], axis=-1)
    out_ref[...] = score_row                                                # [1, n_pad]


# -----------------------------------------------------------------------------
# MetaR_Pertube.forward (single fused pallas_call)
# -----------------------------------------------------------------------------
def metar_pertube_forward(params, support, support_negative, query, negative,
                          *, beta, margin, ablation=False):
    """Forward on pre-embedded task tensors of shape [B, n, 2, EMBED]."""
    B, few, _, E = support.shape
    num_sn, num_q, num_n = support_negative.shape[1], query.shape[1], negative.shape[1]
    assert E == EMBED and OUT == EMBED
    # MarginRankingLoss pairs p_score [B, few] with n_score [B, num_sn] elementwise.
    assert few == num_sn, "few must equal num_sn for the support ranking loss"
    n_total = num_q + num_n
    n_pad = _round_up(n_total, 128)

    def pad_e(x):  # zero-pad embedding dim EMBED -> EPAD (layout plumbing only)
        return jnp.pad(x, ((0, 0),) * (x.ndim - 1) + ((0, EPAD - x.shape[-1]),))

    sup_h, sup_t = pad_e(support[:, :, 0, :]), pad_e(support[:, :, 1, :])
    sng_h, sng_t = pad_e(support_negative[:, :, 0, :]), pad_e(support_negative[:, :, 1, :])
    qe1 = pad_e(jnp.concatenate([query[:, :, 0, :], negative[:, :, 0, :]], axis=1))
    qe2 = pad_e(jnp.concatenate([query[:, :, 1, :], negative[:, :, 1, :]], axis=1))

    kern = functools.partial(
        fused_kernel, n_total=n_total, n_pad=n_pad,
        margin=float(margin), beta=float(beta),
        inv_count=1.0 / float(B * few), ablation=bool(ablation))

    per_batch = lambda b: (b, 0, 0)
    shared2 = lambda b: (0, 0)
    shared3 = lambda b: (0, 0, 0)

    out = pl.pallas_call(
        kern,
        out_shape=jax.ShapeDtypeStruct((B, 1, n_pad), jnp.float32),
        grid=(B,),
        in_specs=[
            pl.BlockSpec((None, few, EPAD), per_batch),        # support heads
            pl.BlockSpec((None, few, EPAD), per_batch),        # support tails
            pl.BlockSpec((None, num_sn, EPAD), per_batch),     # support-neg heads
            pl.BlockSpec((None, num_sn, EPAD), per_batch),     # support-neg tails
            pl.BlockSpec((None, n_total, EPAD), per_batch),    # query+neg heads
            pl.BlockSpec((None, n_total, EPAD), per_batch),    # query+neg tails
            pl.BlockSpec((2 * EPAD, H1P), shared2),            # W1 (head|tail blocks), bf16
            pl.BlockSpec((1, H1P), shared2),                   # b1
            pl.BlockSpec((H1P, H2P), shared2),                 # W2, bf16
            pl.BlockSpec((1, H2P), shared2),                   # b2
            pl.BlockSpec((H2P, OUTP), shared2),                # W3, bf16
            pl.BlockSpec((1, OUTP), shared2),                  # b3
            pl.BlockSpec((3, few, 1), shared3),                # BN scale (3 layers)
            pl.BlockSpec((3, few, 1), shared3),                # BN shift
        ],
        out_specs=pl.BlockSpec((None, 1, n_pad), per_batch),
        compiler_params=pltpu.CompilerParams(
            dimension_semantics=("parallel",)),                # both v7x TCs get work
    )(sup_h, sup_t, sng_h, sng_t, qe1, qe2,
      params["w1"], params["b1"], params["w2"], params["b2"],
      params["w3"], params["b3"], params["bn_scale"], params["bn_shift"])

    scores = out[:, 0, :n_total]
    return scores[:, :num_q], scores[:, num_q:]


# -----------------------------------------------------------------------------
# Deterministic parameter construction (synthetic, matches __init__ shapes)
# -----------------------------------------------------------------------------
def make_params(key, few):
    ks = jax.random.split(key, 6)

    def xavier(k, fi, fo):
        std = (2.0 / (fi + fo)) ** 0.5
        return std * jax.random.normal(k, (fi, fo), jnp.float32)

    def lin_bias(k, fi, fo):
        bound = 1.0 / (fi ** 0.5)
        return jax.random.uniform(k, (1, fo), jnp.float32, -bound, bound)

    w1, b1 = xavier(ks[0], 2 * EMBED, H1), lin_bias(ks[1], 2 * EMBED, H1)
    w2, b2 = xavier(ks[2], H1, H2), lin_bias(ks[3], H1, H2)
    w3, b3 = xavier(ks[4], H2, OUT), lin_bias(ks[5], H2, OUT)

    def pad2(a, rows, cols):
        return jnp.pad(a, ((0, rows - a.shape[0]), (0, cols - a.shape[1])))

    # Split W1 into head/tail blocks, each zero-padded to EPAD rows, so the
    # kernel consumes head/tail embeddings without an in-kernel concat.
    w1_packed = jnp.concatenate(
        [pad2(w1[:EMBED], EPAD, H1P), pad2(w1[EMBED:], EPAD, H1P)], axis=0)

    params = {
        # bf16 weights (halved DMA, MXU-native); biases stay f32 (post-accum add).
        "w1": w1_packed.astype(jnp.bfloat16),              # [256, 512]
        "b1": pad2(b1, 1, H1P),
        "w2": pad2(w2, H1P, H2P).astype(jnp.bfloat16),     # [512, 256]
        "b2": pad2(b2, 1, H2P),
        "w3": pad2(w3, H2P, OUTP).astype(jnp.bfloat16),    # [256, 128]
        "b3": pad2(b3, 1, OUTP),
    }

    # BatchNorm1d(few) eval-mode per-channel scale/shift for the three BN layers,
    # stacked into a single [3, few, 1] pair (identical today: default running
    # stats gamma=1, beta=0, mean=0, var=1 — but kept general).
    gamma = jnp.ones((3, few), jnp.float32)
    beta_bn = jnp.zeros((3, few), jnp.float32)
    r_mean = jnp.zeros((3, few), jnp.float32)
    r_var = jnp.ones((3, few), jnp.float32)
    scale = gamma / jnp.sqrt(r_var + BN_EPS)
    shift = beta_bn - r_mean * scale
    params["bn_scale"] = scale[:, :, None]                 # [3, few, 1]
    params["bn_shift"] = shift[:, :, None]                 # [3, few, 1]
    return params


if __name__ == "__main__":
    B, FEW, NUM_SN, NUM_Q, NUM_N = 2, 2, 2, 3, 3
    BETA, MARGIN = 5.0, 1.0

    key = jax.random.PRNGKey(0)
    k_task, k_par = jax.random.split(key)
    kt = jax.random.split(k_task, 4)
    support = jax.random.normal(kt[0], (B, FEW, 2, EMBED), jnp.float32)
    support_negative = jax.random.normal(kt[1], (B, NUM_SN, 2, EMBED), jnp.float32)
    query = jax.random.normal(kt[2], (B, NUM_Q, 2, EMBED), jnp.float32)
    negative = jax.random.normal(kt[3], (B, NUM_N, 2, EMBED), jnp.float32)

    params = make_params(k_par, FEW)

    fwd = jax.jit(functools.partial(
        metar_pertube_forward, beta=BETA, margin=MARGIN, ablation=False))
    p_score, n_score = fwd(params, support, support_negative, query, negative)
    jax.block_until_ready((p_score, n_score))

    assert p_score.shape == (B, NUM_Q) and n_score.shape == (B, NUM_N)
    assert bool(jnp.all(jnp.isfinite(p_score))) and bool(jnp.all(jnp.isfinite(n_score)))
    print("KERNEL_OK")
</pallas_src>

<mosaic_0001>
module attributes {stable_mosaic.version = 11 : i64} {
  func.func @fused_kernel(%arg0: i32, %arg1: memref<1x2x128xf32, #tpu.memory_space<vmem>>, %arg2: memref<1x2x128xf32, #tpu.memory_space<vmem>>, %arg3: memref<1x2x128xf32, #tpu.memory_space<vmem>>, %arg4: memref<1x2x128xf32, #tpu.memory_space<vmem>>, %arg5: memref<1x6x128xf32, #tpu.memory_space<vmem>>, %arg6: memref<1x6x128xf32, #tpu.memory_space<vmem>>, %arg7: memref<256x512xbf16, #tpu.memory_space<vmem>>, %arg8: memref<1x512xf32, #tpu.memory_space<vmem>>, %arg9: memref<512x256xbf16, #tpu.memory_space<vmem>>, %arg10: memref<1x256xf32, #tpu.memory_space<vmem>>, %arg11: memref<256x128xbf16, #tpu.memory_space<vmem>>, %arg12: memref<1x128xf32, #tpu.memory_space<vmem>>, %arg13: memref<3x2x1xf32, #tpu.memory_space<vmem>>, %arg14: memref<3x2x1xf32, #tpu.memory_space<vmem>>, %arg15: memref<1x1x128xf32, #tpu.memory_space<vmem>>) attributes {dimension_semantics = [#tpu.dimension_semantics<parallel>], iteration_bounds = array<i64: 2>, scalar_prefetch = 0 : i64, scratch_operands = 0 : i64, tpu.core_type = #tpu.core_type<tc>, window_params = [{transform_indices = @transform_0, window_bounds = array<i64: 1, 2, 128>}, {transform_indices = @transform_1, window_bounds = array<i64: 1, 2, 128>}, {transform_indices = @transform_2, window_bounds = array<i64: 1, 2, 128>}, {transform_indices = @transform_3, window_bounds = array<i64: 1, 2, 128>}, {transform_indices = @transform_4, window_bounds = array<i64: 1, 6, 128>}, {transform_indices = @transform_5, window_bounds = array<i64: 1, 6, 128>}, {pipeline_mode = #tpu.pipeline_mode<synchronous>, transform_indices = @transform_6, window_bounds = array<i64: 256, 512>}, {pipeline_mode = #tpu.pipeline_mode<synchronous>, transform_indices = @transform_7, window_bounds = array<i64: 1, 512>}, {pipeline_mode = #tpu.pipeline_mode<synchronous>, transform_indices = @transform_8, window_bounds = array<i64: 512, 256>}, {pipeline_mode = #tpu.pipeline_mode<synchronous>, transform_indices = @transform_9, window_bounds = array<i64: 1, 256>}, {pipeline_mode = #tpu.pipeline_mode<synchronous>, transform_indices = @transform_10, window_bounds = array<i64: 256, 128>}, {pipeline_mode = #tpu.pipeline_mode<synchronous>, transform_indices = @transform_11, window_bounds = array<i64: 1, 128>}, {pipeline_mode = #tpu.pipeline_mode<synchronous>, transform_indices = @transform_12, window_bounds = array<i64: 3, 2, 1>}, {pipeline_mode = #tpu.pipeline_mode<synchronous>, transform_indices = @transform_13, window_bounds = array<i64: 3, 2, 1>}, {transform_indices = @transform_14, window_bounds = array<i64: 1, 1, 128>}]} {
    %c0 = arith.constant 0 : index
    %c0_0 = arith.constant 0 : index
    %c0_1 = arith.constant 0 : index
    %0 = vector.load %arg1[%c0, %c0_0, %c0_1] : memref<1x2x128xf32, #tpu.memory_space<vmem>>, vector<1x2x128xf32>
    %1 = vector.shape_cast %0 : vector<1x2x128xf32> to vector<2x128xf32>
    %c0_2 = arith.constant 0 : index
    %c0_3 = arith.constant 0 : index
    %c0_4 = arith.constant 0 : index
    %2 = vector.load %arg2[%c0_2, %c0_3, %c0_4] : memref<1x2x128xf32, #tpu.memory_space<vmem>>, vector<1x2x128xf32>
    %3 = vector.shape_cast %2 : vector<1x2x128xf32> to vector<2x128xf32>
    %4 = arith.truncf %1 : vector<2x128xf32> to vector<2x128xbf16>
    %c0_5 = arith.constant 0 : index
    %c0_6 = arith.constant 0 : index
    %5 = vector.load %arg7[%c0_5, %c0_6] : memref<256x512xbf16, #tpu.memory_space<vmem>>, vector<128x512xbf16>
    %cst = arith.constant dense<0.000000e+00> : vector<2x512xf32>
    %6 = tpu.matmul %4, %5, %cst {dimension_numbers = #tpu.dot_dimension_numbers<[1], [0], [0], [1], [0, 0, 1, 1], [], []>} : vector<2x128xbf16>, vector<128x512xbf16>, vector<2x512xf32> -> vector<2x512xf32>
    %7 = arith.truncf %3 : vector<2x128xf32> to vector<2x128xbf16>
    %c128 = arith.constant 128 : index
    %c0_7 = arith.constant 0 : index
    %8 = vector.load %arg7[%c128, %c0_7] : memref<256x512xbf16, #tpu.memory_space<vmem>>, vector<128x512xbf16>
    %cst_8 = arith.constant dense<0.000000e+00> : vector<2x512xf32>
    %9 = tpu.matmul %7, %8, %cst_8 {dimension_numbers = #tpu.dot_dimension_numbers<[1], [0], [0], [1], [0, 0, 1, 1], [], []>} : vector<2x128xbf16>, vector<128x512xbf16>, vector<2x512xf32> -> vector<2x512xf32>
    %10 = arith.addf %6, %9 : vector<2x512xf32>
    %c0_9 = arith.constant 0 : index
    %c0_10 = arith.constant 0 : index
    %11 = vector.load %arg8[%c0_9, %c0_10] : memref<1x512xf32, #tpu.memory_space<vmem>>, vector<1x512xf32>
    %12 = vector.broadcast %11 : vector<1x512xf32> to vector<2x512xf32>
    %13 = arith.addf %10, %12 : vector<2x512xf32>
    %c0_11 = arith.constant 0 : index
    %c0_12 = arith.constant 0 : index
    %c0_13 = arith.constant 0 : index
    %14 = vector.load %arg13[%c0_11, %c0_12, %c0_13] : memref<3x2x1xf32, #tpu.memory_space<vmem>>, vector<1x2x1xf32>
    %15 = vector.shape_cast %14 : vector<1x2x1xf32> to vector<2x1xf32>
    %16 = vector.broadcast %15 : vector<2x1xf32> to vector<2x512xf32>
    %17 = arith.mulf %13, %16 : vector<2x512xf32>
    %c0_14 = arith.constant 0 : index
    %c0_15 = arith.constant 0 : index
    %c0_16 = arith.constant 0 : index
    %18 = vector.load %arg14[%c0_14, %c0_15, %c0_16] : memref<3x2x1xf32, #tpu.memory_space<vmem>>, vector<1x2x1xf32>
    %19 = vector.shape_cast %18 : vector<1x2x1xf32> to vector<2x1xf32>
    %20 = vector.broadcast %19 : vector<2x1xf32> to vector<2x512xf32>
    %21 = arith.addf %17, %20 : vector<2x512xf32>
    %cst_17 = arith.constant 0.000000e+00 : f32
    %22 = vector.broadcast %cst_17 : f32 to vector<2x512xf32>
    %23 = arith.cmpf oge, %21, %22 : vector<2x512xf32>
    %cst_18 = arith.constant 0.00999999977 : f32
    %24 = vector.broadcast %cst_18 : f32 to vector<2x512xf32>
    %25 = arith.mulf %24, %21 : vector<2x512xf32>
    %26 = arith.select %23, %21, %25 : vector<2x512xi1>, vector<2x512xf32>
    %27 = arith.truncf %26 : vector<2x512xf32> to vector<2x512xbf16>
    %c0_19 = arith.constant 0 : index
    %c0_20 = arith.constant 0 : index
    %28 = vector.load %arg9[%c0_19, %c0_20] : memref<512x256xbf16, #tpu.memory_space<vmem>>, vector<512x256xbf16>
    %cst_21 = arith.constant dense<0.000000e+00> : vector<2x256xf32>
    %29 = tpu.matmul %27, %28, %cst_21 {dimension_numbers = #tpu.dot_dimension_numbers<[1], [0], [0], [1], [0, 0, 1, 1], [], []>} : vector<2x512xbf16>, vector<512x256xbf16>, vector<2x256xf32> -> vector<2x256xf32>
    %c0_22 = arith.constant 0 : index
    %c0_23 = arith.constant 0 : index
    %30 = vector.load %arg10[%c0_22, %c0_23] : memref<1x256xf32, #tpu.memory_space<vmem>>, vector<1x256xf32>
    %31 = vector.broadcast %30 : vector<1x256xf32> to vector<2x256xf32>
    %32 = arith.addf %29, %31 : vector<2x256xf32>
    %c1 = arith.constant 1 : index
    %c0_24 = arith.constant 0 : index
    %c0_25 = arith.constant 0 : index
    %33 = vector.load %arg13[%c1, %c0_24, %c0_25] : memref<3x2x1xf32, #tpu.memory_space<vmem>>, vector<1x2x1xf32>
    %34 = vector.shape_cast %33 : vector<1x2x1xf32> to vector<2x1xf32>
    %35 = vector.broadcast %34 : vector<2x1xf32> to vector<2x256xf32>
    %36 = arith.mulf %32, %35 : vector<2x256xf32>
    %c1_26 = arith.constant 1 : index
    %c0_27 = arith.constant 0 : index
    %c0_28 = arith.constant 0 : index
    %37 = vector.load %arg14[%c1_26, %c0_27, %c0_28] : memref<3x2x1xf32, #tpu.memory_space<vmem>>, vector<1x2x1xf32>
    %38 = vector.shape_cast %37 : vector<1x2x1xf32> to vector<2x1xf32>
    %39 = vector.broadcast %38 : vector<2x1xf32> to vector<2x256xf32>
    %40 = arith.addf %36, %39 : vector<2x256xf32>
    %cst_29 = arith.constant 0.000000e+00 : f32
    %41 = vector.broadcast %cst_29 : f32 to vector<2x256xf32>
    %42 = arith.cmpf oge, %40, %41 : vector<2x256xf32>
    %cst_30 = arith.constant 0.00999999977 : f32
    %43 = vector.broadcast %cst_30 : f32 to vector<2x256xf32>
    %44 = arith.mulf %43, %40 : vector<2x256xf32>
    %45 = arith.select %42, %40, %44 : vector<2x256xi1>, vector<2x256xf32>
    %46 = arith.truncf %45 : vector<2x256xf32> to vector<2x256xbf16>
    %c0_31 = arith.constant 0 : index
    %c0_32 = arith.constant 0 : index
    %47 = vector.load %arg11[%c0_31, %c0_32] : memref<256x128xbf16, #tpu.memory_space<vmem>>, vector<256x128xbf16>
    %cst_33 = arith.constant dense<0.000000e+00> : vector<2x128xf32>
    %48 = tpu.matmul %46, %47, %cst_33 {dimension_numbers = #tpu.dot_dimension_numbers<[1], [0], [0], [1], [0, 0, 1, 1], [], []>} : vector<2x256xbf16>, vector<256x128xbf16>, vector<2x128xf32> -> vector<2x128xf32>
    %c0_34 = arith.constant 0 : index
    %c0_35 = arith.constant 0 : index
    %49 = vector.load %arg12[%c0_34, %c0_35] : memref<1x128xf32, #tpu.memory_space<vmem>>, vector<1x128xf32>
    %50 = vector.broadcast %49 : vector<1x128xf32> to vector<2x128xf32>
    %51 = arith.addf %48, %50 : vector<2x128xf32>
    %c2 = arith.constant 2 : index
    %c0_36 = arith.constant 0 : index
    %c0_37 = arith.constant 0 : index
    %52 = vector.load %arg13[%c2, %c0_36, %c0_37] : memref<3x2x1xf32, #tpu.memory_space<vmem>>, vector<1x2x1xf32>
    %53 = vector.shape_cast %52 : vector<1x2x1xf32> to vector<2x1xf32>
    %54 = vector.broadcast %53 : vector<2x1xf32> to vector<2x128xf32>
    %55 = arith.mulf %51, %54 : vector<2x128xf32>
    %c2_38 = arith.constant 2 : index
    %c0_39 = arith.constant 0 : index
    %c0_40 = arith.constant 0 : index
    %56 = vector.load %arg14[%c2_38, %c0_39, %c0_40] : memref<3x2x1xf32, #tpu.memory_space<vmem>>, vector<1x2x1xf32>
    %57 = vector.shape_cast %56 : vector<1x2x1xf32> to vector<2x1xf32>
    %58 = vector.broadcast %57 : vector<2x1xf32> to vector<2x128xf32>
    %59 = arith.addf %55, %58 : vector<2x128xf32>
    %60 = tpu.iota {dimensions = array<i32: 1>} : vector<1x128xi32>
    %c100_i32 = arith.constant 100 : i32
    %61 = vector.broadcast %c100_i32 : i32 to vector<1x128xi32>
    %62 = arith.cmpi slt, %60, %61 : vector<1x128xi32>
    %cst_41 = arith.constant 0.000000e+00 : f32
    %63 = vector.shape_cast %62 : vector<1x128xi1> to vector<1x128xi1>
    %64 = vector.broadcast %63 : vector<1x128xi1> to vector<2x128xi1>
    %65 = vector.broadcast %cst_41 : f32 to vector<2x128xf32>
    %66 = arith.select %64, %59, %65 : vector<2x128xi1>, vector<2x128xf32>
    %cst_42 = arith.constant dense<0.000000e+00> : vector<128xf32>
    %67 = vector.multi_reduction <add>, %66, %cst_42 [0] : vector<2x128xf32> to vector<128xf32>
    %68 = vector.shape_cast %67 : vector<128xf32> to vector<1x128xf32>
    %cst_43 = arith.constant 2.000000e+00 : f32
    %69 = vector.broadcast %cst_43 : f32 to vector<1x128xf32>
    %70 = arith.divf %68, %69 : vector<1x128xf32>
    %71 = vector.broadcast %70 : vector<1x128xf32> to vector<2x128xf32>
    %72 = arith.addf %1, %71 : vector<2x128xf32>
    %73 = arith.subf %72, %3 : vector<2x128xf32>
    %c0_44 = arith.constant 0 : index
    %c0_45 = arith.constant 0 : index
    %c0_46 = arith.constant 0 : index
    %74 = vector.load %arg3[%c0_44, %c0_45, %c0_46] : memref<1x2x128xf32, #tpu.memory_space<vmem>>, vector<1x2x128xf32>
    %75 = vector.shape_cast %74 : vector<1x2x128xf32> to vector<2x128xf32>
    %76 = vector.broadcast %70 : vector<1x128xf32> to vector<2x128xf32>
    %77 = arith.addf %75, %76 : vector<2x128xf32>
    %c0_47 = arith.constant 0 : index
    %c0_48 = arith.constant 0 : index
    %c0_49 = arith.constant 0 : index
    %78 = vector.load %arg4[%c0_47, %c0_48, %c0_49] : memref<1x2x128xf32, #tpu.memory_space<vmem>>, vector<1x2x128xf32>
    %79 = vector.shape_cast %78 : vector<1x2x128xf32> to vector<2x128xf32>
    %80 = arith.subf %77, %79 : vector<2x128xf32>
    %81 = arith.mulf %73, %73 : vector<2x128xf32>
    %cst_50 = arith.constant dense<0.000000e+00> : vector<2xf32>
    %82 = vector.multi_reduction <add>, %81, %cst_50 [1] : vector<2x128xf32> to vector<2xf32>
    %83 = vector.shape_cast %82 : vector<2xf32> to vector<2x1xf32>
    %84 = arith.mulf %80, %80 : vector<2x128xf32>
    %cst_51 = arith.constant dense<0.000000e+00> : vector<2xf32>
    %85 = vector.multi_reduction <add>, %84, %cst_51 [1] : vector<2x128xf32> to vector<2xf32>
    %86 = vector.shape_cast %85 : vector<2xf32> to vector<2x1xf32>
    %cst_52 = arith.constant 1.000000e-30 : f32
    %87 = vector.broadcast %cst_52 : f32 to vector<2x1xf32>
    %88 = arith.maximumf %83, %87 : vector<2x1xf32>
    %89 = math.rsqrt %88 : vector<2x1xf32>
    %cst_53 = arith.constant 1.000000e-30 : f32
    %90 = vector.broadcast %cst_53 : f32 to vector<2x1xf32>
    %91 = arith.maximumf %86, %90 : vector<2x1xf32>
    %92 = math.rsqrt %91 : vector<2x1xf32>
    %93 = arith.mulf %83, %89 : vector<2x1xf32>
    %94 = arith.mulf %86, %92 : vector<2x1xf32>
    %cst_54 = arith.constant 1.000000e+00 : f32
    %95 = vector.broadcast %cst_54 : f32 to vector<2x1xf32>
    %96 = arith.addf %95, %93 : vector<2x1xf32>
    %97 = arith.subf %96, %94 : vector<2x1xf32>
    %cst_55 = arith.constant 0.000000e+00 : f32
    %98 = vector.broadcast %cst_55 : f32 to vector<2x1xf32>
    %99 = arith.cmpf ogt, %97, %98 : vector<2x1xf32>
    %100 = vector.broadcast %89 : vector<2x1xf32> to vector<2x128xf32>
    %101 = arith.mulf %73, %100 : vector<2x128xf32>
    %102 = vector.broadcast %92 : vector<2x1xf32> to vector<2x128xf32>
    %103 = arith.mulf %80, %102 : vector<2x128xf32>
    %104 = arith.subf %101, %103 : vector<2x128xf32>
    %cst_56 = arith.constant 0.000000e+00 : f32
    %105 = vector.shape_cast %99 : vector<2x1xi1> to vector<2x1xi1>
    %106 = vector.broadcast %105 : vector<2x1xi1> to vector<2x128xi1>
    %107 = vector.broadcast %cst_56 : f32 to vector<2x128xf32>
    %108 = arith.select %106, %104, %107 : vector<2x128xi1>, vector<2x128xf32>
    %cst_57 = arith.constant dense<0.000000e+00> : vector<128xf32>
    %109 = vector.multi_reduction <add>, %108, %cst_57 [0] : vector<2x128xf32> to vector<128xf32>
    %110 = vector.shape_cast %109 : vector<128xf32> to vector<1x128xf32>
    %cst_58 = arith.constant 2.500000e-01 : f32
    %111 = vector.broadcast %cst_58 : f32 to vector<1x128xf32>
    %112 = arith.mulf %111, %110 : vector<1x128xf32>
    %cst_59 = arith.constant 5.000000e+00 : f32
    %113 = vector.broadcast %cst_59 : f32 to vector<1x128xf32>
    %114 = arith.mulf %113, %112 : vector<1x128xf32>
    %115 = arith.subf %70, %114 : vector<1x128xf32>
    %c0_60 = arith.constant 0 : index
    %c0_61 = arith.constant 0 : index
    %c0_62 = arith.constant 0 : index
    %116 = vector.load %arg5[%c0_60, %c0_61, %c0_62] : memref<1x6x128xf32, #tpu.memory_space<vmem>>, vector<1x6x128xf32>
    %117 = vector.shape_cast %116 : vector<1x6x128xf32> to vector<6x128xf32>
    %118 = vector.broadcast %115 : vector<1x128xf32> to vector<6x128xf32>
    %119 = arith.addf %117, %118 : vector<6x128xf32>
    %c0_63 = arith.constant 0 : index
    %c0_64 = arith.constant 0 : index
    %c0_65 = arith.constant 0 : index
    %120 = vector.load %arg6[%c0_63, %c0_64, %c0_65] : memref<1x6x128xf32, #tpu.memory_space<vmem>>, vector<1x6x128xf32>
    %121 = vector.shape_cast %120 : vector<1x6x128xf32> to vector<6x128xf32>
    %122 = arith.subf %119, %121 : vector<6x128xf32>
    %123 = arith.mulf %122, %122 : vector<6x128xf32>
    %cst_66 = arith.constant 1.000000e+00 : f32
    %124 = vector.broadcast %cst_66 : f32 to vector<1x128xf32>
    %cst_67 = arith.constant dense<0.000000e+00> : vector<1x6xf32>
    %125 = tpu.matmul %124, %123, %cst_67 {dimension_numbers = #tpu.dot_dimension_numbers<[1], [1], [0], [0], [0, 0, 1, 0], [], []>} : vector<1x128xf32>, vector<6x128xf32>, vector<1x6xf32> -> vector<1x6xf32>
    %126 = math.sqrt %125 : vector<1x6xf32>
    %cst_68 = arith.constant 0.000000e+00 : f32
    %127 = vector.broadcast %cst_68 : f32 to vector<1x6xf32>
    %128 = arith.subf %127, %126 : vector<1x6xf32>
    %cst_69 = arith.constant 0.000000e+00 : f32
    %129 = vector.broadcast %cst_69 : f32 to vector<1x122xf32>
    %130 = tpu.concatenate %128, %129 in 1 : vector<1x6xf32>, vector<1x122xf32> -> vector<1x128xf32>
    %c0_70 = arith.constant 0 : index
    %c0_71 = arith.constant 0 : index
    %c0_72 = arith.constant 0 : index
    %131 = vector.load %arg15[%c0_70, %c0_71, %c0_72] : memref<1x1x128xf32, #tpu.memory_space<vmem>>, vector<1x1x128xf32>
    %132 = vector.shape_cast %131 : vector<1x1x128xf32> to vector<1x128xf32>
    %133 = vector.shape_cast %130 : vector<1x128xf32> to vector<1x1x128xf32>
    tpu.vector_store %arg15[%c0_70, %c0_71, %c0_72], %133 {strides = array<i32>} : memref<1x1x128xf32, #tpu.memory_space<vmem>>, vector<1x1x128xf32>,
    return
  }
  func.func @transform_0(%arg0: i32) -> (i32, i32, i32) {
    %c0_i32 = arith.constant 0 : i32
    %c0_i32_0 = arith.constant 0 : i32
    %c0_i32_1 = arith.constant 0 : i32
    return %arg0, %c0_i32, %c0_i32_0 : i32, i32, i32
  }
  func.func @transform_1(%arg0: i32) -> (i32, i32, i32) {
    %c0_i32 = arith.constant 0 : i32
    %c0_i32_0 = arith.constant 0 : i32
    %c0_i32_1 = arith.constant 0 : i32
    return %arg0, %c0_i32, %c0_i32_0 : i32, i32, i32
  }
  func.func @transform_2(%arg0: i32) -> (i32, i32, i32) {
    %c0_i32 = arith.constant 0 : i32
    %c0_i32_0 = arith.constant 0 : i32
    %c0_i32_1 = arith.constant 0 : i32
    return %arg0, %c0_i32, %c0_i32_0 : i32, i32, i32
  }
  func.func @transform_3(%arg0: i32) -> (i32, i32, i32) {
    %c0_i32 = arith.constant 0 : i32
    %c0_i32_0 = arith.constant 0 : i32
    %c0_i32_1 = arith.constant 0 : i32
    return %arg0, %c0_i32, %c0_i32_0 : i32, i32, i32
  }
  func.func @transform_4(%arg0: i32) -> (i32, i32, i32) {
    %c0_i32 = arith.constant 0 : i32
    %c0_i32_0 = arith.constant 0 : i32
    %c0_i32_1 = arith.constant 0 : i32
    return %arg0, %c0_i32, %c0_i32_0 : i32, i32, i32
  }
  func.func @transform_5(%arg0: i32) -> (i32, i32, i32) {
    %c0_i32 = arith.constant 0 : i32
    %c0_i32_0 = arith.constant 0 : i32
    %c0_i32_1 = arith.constant 0 : i32
    return %arg0, %c0_i32, %c0_i32_0 : i32, i32, i32
  }
  func.func @transform_6(%arg0: i32) -> (i32, i32) {
    %c0_i32 = arith.constant 0 : i32
    %c0_i32_0 = arith.constant 0 : i32
    %c0_i32_1 = arith.constant 0 : i32
    return %c0_i32, %c0_i32_0 : i32, i32
  }
  func.func @transform_7(%arg0: i32) -> (i32, i32) {
    %c0_i32 = arith.constant 0 : i32
    %c0_i32_0 = arith.constant 0 : i32
    %c0_i32_1 = arith.constant 0 : i32
    return %c0_i32, %c0_i32_0 : i32, i32
  }
  func.func @transform_8(%arg0: i32) -> (i32, i32) {
    %c0_i32 = arith.constant 0 : i32
    %c0_i32_0 = arith.constant 0 : i32
    %c0_i32_1 = arith.constant 0 : i32
    return %c0_i32, %c0_i32_0 : i32, i32
  }
  func.func @transform_9(%arg0: i32) -> (i32, i32) {
    %c0_i32 = arith.constant 0 : i32
    %c0_i32_0 = arith.constant 0 : i32
    %c0_i32_1 = arith.constant 0 : i32
    return %c0_i32, %c0_i32_0 : i32, i32
  }
  func.func @transform_10(%arg0: i32) -> (i32, i32) {
    %c0_i32 = arith.constant 0 : i32
    %c0_i32_0 = arith.constant 0 : i32
    %c0_i32_1 = arith.constant 0 : i32
    return %c0_i32, %c0_i32_0 : i32, i32
  }
  func.func @transform_11(%arg0: i32) -> (i32, i32) {
    %c0_i32 = arith.constant 0 : i32
    %c0_i32_0 = arith.constant 0 : i32
    %c0_i32_1 = arith.constant 0 : i32
    return %c0_i32, %c0_i32_0 : i32, i32
  }
  func.func @transform_12(%arg0: i32) -> (i32, i32, i32) {
    %c0_i32 = arith.constant 0 : i32
    %c0_i32_0 = arith.constant 0 : i32
    %c0_i32_1 = arith.constant 0 : i32
    %c0_i32_2 = arith.constant 0 : i32
    return %c0_i32, %c0_i32_0, %c0_i32_1 : i32, i32, i32
  }
  func.func @transform_13(%arg0: i32) -> (i32, i32, i32) {
    %c0_i32 = arith.constant 0 : i32
    %c0_i32_0 = arith.constant 0 : i32
    %c0_i32_1 = arith.constant 0 : i32
    %c0_i32_2 = arith.constant 0 : i32
    return %c0_i32, %c0_i32_0, %c0_i32_1 : i32, i32, i32
  }
  func.func @transform_14(%arg0: i32) -> (i32, i32, i32) {
    %c0_i32 = arith.constant 0 : i32
    %c0_i32_0 = arith.constant 0 : i32
    %c0_i32_1 = arith.constant 0 : i32
    return %arg0, %c0_i32, %c0_i32_0 : i32, i32, i32
  }
}

</mosaic_0001>

<bundles_post_ra>
// kernel: metar_pertube_forward.1
= control target key start
LH: loop header
LB: loop body
LE: loop exit
PB: predicated region body
PF: predicated region fallthrough
CT: control target
= control target key end

     0   :  { %19 = vsyncpa [#allocation3], 0  ;;  %s3023_s0 = inlined_call_operand.vmem [shape: f32[2,2,128], index: 0, kind: input, shape index: {}]   ;;  %s3024_s1 = inlined_call_operand.vmem [shape: f32[2,2,128], index: 1, kind: input, shape index: {}]   ;;  %s3025_s2 = inlined_call_operand.vmem [shape: f32[2,2,128], index: 2, kind: input, shape index: {}]   ;;  %s3026_s3 = inlined_call_operand.vmem [shape: f32[2,2,128], index: 3, kind: input, shape index: {}]   ;;  %s3027_s4 = inlined_call_operand.vmem [shape: f32[2,6,128], index: 4, kind: input, shape index: {}]   ;;  %s3028_s5 = inlined_call_operand.vmem [shape: f32[2,6,128], index: 5, kind: input, shape index: {}]   ;;  %s3029_s6 = inlined_call_operand.hbm [shape: bf16[256,512], index: 6, kind: input, shape index: {}]   ;;  %s3030_s7 = inlined_call_operand.vmem [shape: f32[1,512], index: 7, kind: input, shape index: {}]   ;;  %s3031_s8 = inlined_call_operand.hbm [shape: bf16[512,256], index: 8, kind: input, shape index: {}]   ;;  %s3032_s9 = inlined_call_operand.vmem [shape: f32[1,256], index: 9, kind: input, shape index: {}]   ;;  %s3033_s10 = inlined_call_operand.vmem [shape: bf16[256,128], index: 10, kind: input, shape index: {}]   ;;  %s3034_s11 = inlined_call_operand.vmem [shape: f32[1,128], index: 11, kind: input, shape index: {}]   ;;  %s3035_s12 = inlined_call_operand.vmem [shape: f32[3,2,1], index: 12, kind: input, shape index: {}]   ;;  %s3036_s13 = inlined_call_operand.vmem [shape: f32[3,2,1], index: 13, kind: input, shape index: {}]   ;;  %s3037_s14 = inlined_call_operand.vmem [shape: f32[2,1,128], index: 14, kind: output, shape index: {}]  }
   0x1   :  { %20 = vsyncpa [#allocation5], 0  ;;  %s2767_s29 = smov 0  }
   0x2 LB: > { %3041 = sst [smem:[#allocation8_spill]] %s2680_s29  ;;  %s2682_s30 = smov [#allocation2]   ;;  %s2680_s29 = sphi %s2767_s29, %s26_s29  }
   0x3   : > { %s393_s15 = sshll.u32 %s2682_s30, 4  ;;  %s2773_s16 = sadd.s32 4294967295, %s2680_s29   ;;  %s394_s15 = int_to_ptr.vmem [resolvable:$true] %s393_s15 }
   0x4   : > { %p2158_p0 = scmp.ge.s32.totalorder %s2680_s29, 1  ;;  %p381_p1 = scmp.lt.s32.totalorder %s2680_s29, 3 }
   0x5   : > { %p3038_p3 = scmp.eq.s32.totalorder %s2773_s16, 0  ;;  %s2683_s18 = smov [#allocation4]  }
   0x6   : > { %p2777_p2 = pnand %p2158_p0, %p381_p1  ;;  %s409_s19 = sshll.u32 %s2683_s18, 4  ;;  %s2790_s19 = int_to_ptr.vmem [resolvable:$true] %s409_s19 }
   0x7   : > { %s2610_s23 = scalar_lea.hbm %s3029_s6, 8192 }
   0x8   : > { %s3042_s17 = scalar_select %p2777_p2, 1, 0 }
   0x9   : > { %p2365_p4 = pneg %p2777_p2  ;;  %p2611_p6 = scmp.ne.s32.totalorder %s3029_s6, %s2610_s23 }
   0xa   : > { %p2617_p10 = scmp.lt.u32.totalorder %s2610_s23, %s3029_s6 }
   0xb   : > { %p2786_p5 = pnand %p3038_p3, %p2365_p4 }
   0xd   : > { %p2612_p7 = pneg %p2786_p5 }
   0xf   : > { %p2613_p8 = pnand %p2612_p7, %p2611_p6 }
  0x11   : > { %p2614_p9 = pneg %p2613_p8 }
  0x13   : > { %p2619_p11 = pnand %p2617_p10, %p2614_p9 }
  0x15   : > { %2622 = shalt.err (!%p2619_p11)
}
  0x16   : > { %s2623_s28 = scalar_lea.vmem %s394_s15, 8192  ;;  %p2631_p1 = scmp.lt.s32.totalorder %s394_s15, %s394_s15 }
  0x17   : > { %p2624_p12 = scmp.ne.s32.totalorder %s394_s15, %s2623_s28  ;;  %p2632_p4 = scmp.lt.s32.totalorder %s2623_s28, %s2623_s28 }
  0x19   : > { %p2626_p13 = pnand %p2624_p12, %p2612_p7  ;;  %p2633_p3 = por %p2632_p4, %p2631_p1 }
  0x1b   : > { %p2627_p0 = pneg %p2626_p13 }
  0x1d   : > { %p2634_p2 = pnand %p2633_p3, %p2627_p0 }
  0x1f   : > { %2637 = shalt.err (!%p2634_p2)
}
  0x20   : > { %s2684_s30 = smov 256   ;;  %s2685_s18 = smov 16  }
  0x21   : > { %2368 = dma.hbm_to_vmem [thread:$0]  (!%p2786_p5), %s3029_s6, 8192, %s394_s15, [#allocation3], %s2684_s30, %s2684_s30, %s2685_s18  }
  0x22   : > { %s2638_s25 = scalar_lea.hbm %s3031_s8, 8192 }
  0x23   : > { %p2639_p6 = scmp.ne.s32.totalorder %s3031_s8, %s2638_s25  ;;  %p2645_p8 = scmp.lt.u32.totalorder %s2638_s25, %s3031_s8 }
  0x25   : > { %p2641_p2 = pnand %p2639_p6, %p2612_p7 }
  0x27   : > { %p2642_p3 = pneg %p2641_p2 }
  0x29   : > { %p2647_p9 = pnand %p2645_p8, %p2642_p3 }
  0x2b   : > { %2650 = shalt.err (!%p2647_p9)
}
  0x2c   : > { %s2651_s15 = scalar_lea.vmem %s2790_s19, 8192  ;;  %p2659_p13 = scmp.lt.s32.totalorder %s2790_s19, %s2790_s19 }
  0x2d   : > { %p2652_p10 = scmp.ne.s32.totalorder %s2790_s19, %s2651_s15  ;;  %p2660_p0 = scmp.lt.s32.totalorder %s2651_s15, %s2651_s15 }
  0x2f   : > { %p2654_p11 = pnand %p2652_p10, %p2612_p7  ;;  %p2661_p1 = por %p2660_p0, %p2659_p13 }
  0x31   : > { %p2655_p12 = pneg %p2654_p11 }
  0x33   : > { %p2662_p4 = pnand %p2661_p1, %p2655_p12 }
  0x35   : > { %2665 = shalt.err (!%p2662_p4)
}
  0x36   : > { %s2686_s29 = smov 128   ;;  %s2687_s30 = smov 8  }
  0x37   : > { %2371 = dma.hbm_to_vmem [thread:$0]  (!%p2786_p5), %s3031_s8, 8192, %s2790_s19, [#allocation5], %s2686_s29, %s2686_s29, %s2687_s30  }
  0x38   : > { %p3044_p6 = scmp.ne.s32.totalorder %s3042_s17, 0 }
  0x39   : > { %p3045_p7 = scmp.eq.s32.totalorder (!%p3044_p6), %s2773_s16, 0 }
  0x3a   : > { %482 = sbr.rel (%p3044_p6) target bundleno = 1288 (0x508), region = 76 }
  0x41   : > { %2671 = dma.done.wait (%p3045_p7), [#allocation3], 8192   ;;  %p3046_p2 = pmov %p3045_p7 }
  0x43   : > { %2673 = vsyncadd (%p3046_p2), [#allocation3], 4294959104  ;;  %p3047_p3 = pmov %p3046_p2 }
  0x44   : > { %p3048_p8 = pmov %p3046_p2 }
  0x45   : > { %2675 = dma.done.wait (%p3047_p3), [#allocation5], 8192  }
  0x46   : > { %2677 = vsyncadd (%p3048_p8), [#allocation5], 4294959104  ;;  %v2688_v0 = vmov 0   ;;  %v2396_v1 = vld [vmem:[#allocation2 + $0x104] ss:$16 sps:$4 sm:$0xff]   ;;  %p549_p5 = scmp.lt.s32.totalorder %s2773_s16, 1 }
  0x47   : > { %837 = vmatprep.mubr.bf16.mxu1 %v2688_v0  ;;  %1079 = vmatprep.mubr.bf16.mxu0 %v2688_v0  ;;  %v2398_v2 = vld [vmem:[#allocation2 + $0x4] ss:$16 sps:$4 sm:$0xff]   ;;  %v2400_v3 = vld [vmem:[#allocation2 + $0x100] ss:$16 sps:$4 sm:$0xff]   ;;  %v2446_v35 = vld [vmem:[#allocation2 + $0x10c] ss:$16 sps:$4 sm:$0xff]  }
  0x48   : > { %2394 = vset.pattern.permute.xlu0 %v2688_v0  ;;  %2395 = vset.pattern.permute.xlu1 %v2688_v0  ;;  %v2401_v4 = vld [vmem:[#allocation2] ss:$16 sps:$4 sm:$0xff]   ;;  %v2402_v5 = vld [vmem:[#allocation2 + $0x124] ss:$16 sps:$4 sm:$0xff]   ;;  %s3051_s16 = smov (!%p549_p5, %s2773_s16), 1  ;;  %vm1892_vm7 = vcmask 1041408  }
  0x49   : > { %805 = vmatprep.subr.bf16.mxu1 %v2396_v1  ;;  %1047 = vmatprep.subr.bf16.mxu0 %v2398_v2  ;;  %v2404_v6 = vld [vmem:[#allocation2 + $0x24] ss:$16 sps:$4 sm:$0xff]   ;;  %v2406_v7 = vld [vmem:[#allocation2 + $0x120] ss:$16 sps:$4 sm:$0xff]   ;;  %s2858_s17 = sshll.u32 %s3051_s16, 1  ;;  %vm2690_vm8 = vmmov 0   ;;  %s575_s19 = scalar_lea.vmem %s3037_s14, %s3051_s16 }
  0x4a   : > { %806 = vmatpush1.bf16.msra.mxu1 %v2400_v3  ;;  %1048 = vmatpush1.bf16.msra.mxu0 %v2401_v4  ;;  %v2407_v8 = vld [vmem:[#allocation2 + $0x20] ss:$16 sps:$4 sm:$0xff]   ;;  %v2408_v9 = vld [vmem:[#allocation2 + $0x144] ss:$16 sps:$4 sm:$0xff]   ;;  %s556_s22 = scalar_lea.vmem %s3024_s1, %s2858_s17  ;;  %s552_s25 = scalar_lea.vmem %s3023_s0, %s2858_s17  ;;  %v2444_v38 = vld [vmem:[#allocation2 + $0x108] ss:$16 sps:$4 sm:$0xff]  }
  0x4b   : > { %807 = vmatprep.subr.bf16.mxu1 %v2402_v5  ;;  %1049 = vmatprep.subr.bf16.mxu0 %v2404_v6  ;;  %v2410_v10 = vld [vmem:[#allocation2 + $0x44] ss:$16 sps:$4 sm:$0xff]   ;;  %v2412_v11 = vld [vmem:[#allocation2 + $0x140] ss:$16 sps:$4 sm:$0xff]   ;;  %v2449_v39 = vld [vmem:[#allocation2 + $0x12c] ss:$16 sps:$4 sm:$0xff]  }
  0x4c   : > { %v2413_v12 = vld [vmem:[#allocation2 + $0x40] ss:$16 sps:$4 sm:$0xff]   ;;  %v2414_v13 = vld [vmem:[#allocation2 + $0x164] ss:$16 sps:$4 sm:$0xff]   ;;  %v2447_v40 = vld [vmem:[#allocation2 + $0x128] ss:$16 sps:$4 sm:$0xff]  }
  0x4d   : > { %v2416_v14 = vld [vmem:[#allocation2 + $0x64] ss:$16 sps:$4 sm:$0xff]   ;;  %v2418_v15 = vld [vmem:[#allocation2 + $0x160] ss:$16 sps:$4 sm:$0xff]   ;;  %v2452_v41 = vld [vmem:[#allocation2 + $0x14c] ss:$16 sps:$4 sm:$0xff]  }
  0x4e   : > { %808 = vmatpush1.bf16.msra.mxu1 %v2406_v7  ;;  %1050 = vmatpush1.bf16.msra.mxu0 %v2407_v8  ;;  %v2419_v16 = vld [vmem:[#allocation2 + $0x60] ss:$16 sps:$4 sm:$0xff]   ;;  %v2420_v17 = vld [vmem:[#allocation2 + $0x184] ss:$16 sps:$4 sm:$0xff]   ;;  %v2450_v42 = vld [vmem:[#allocation2 + $0x148] ss:$16 sps:$4 sm:$0xff]  }
  0x4f   : > { %809 = vmatprep.subr.bf16.mxu1 %v2408_v9  ;;  %1051 = vmatprep.subr.bf16.mxu0 %v2410_v10  ;;  %v2422_v18 = vld [vmem:[#allocation2 + $0x84] ss:$16 sps:$4 sm:$0xff]   ;;  %v2424_v19 = vld [vmem:[#allocation2 + $0x180] ss:$16 sps:$4 sm:$0xff]   ;;  %v2455_v43 = vld [vmem:[#allocation2 + $0x16c] ss:$16 sps:$4 sm:$0xff]  }
  0x50   : > { %v2425_v20 = vld [vmem:[#allocation2 + $0x80] ss:$16 sps:$4 sm:$0xff]   ;;  %v2426_v21 = vld [vmem:[#allocation2 + $0x1a4] ss:$16 sps:$4 sm:$0xff]   ;;  %v2453_v44 = vld [vmem:[#allocation2 + $0x168] ss:$16 sps:$4 sm:$0xff]  }
  0x51   : > { %v2428_v22 = vld [vmem:[#allocation2 + $0xa4] ss:$16 sps:$4 sm:$0xff]   ;;  %v2430_v23 = vld [vmem:[#allocation2 + $0x1a0] ss:$16 sps:$4 sm:$0xff]   ;;  %v2458_v45 = vld [vmem:[#allocation2 + $0x18c] ss:$16 sps:$4 sm:$0xff]  }
  0x52   : > { %810 = vmatpush1.bf16.msra.mxu1 %v2412_v11  ;;  %1052 = vmatpush1.bf16.msra.mxu0 %v2413_v12  ;;  %v2431_v24 = vld [vmem:[#allocation2 + $0xa0] ss:$16 sps:$4 sm:$0xff]   ;;  %v2432_v25 = vld [vmem:[#allocation2 + $0x1c4] ss:$16 sps:$4 sm:$0xff]   ;;  %v2456_v51 = vld [vmem:[#allocation2 + $0x188] ss:$16 sps:$4 sm:$0xff]  }
  0x53   : > { %811 = vmatprep.subr.bf16.mxu1 %v2414_v13  ;;  %1053 = vmatprep.subr.bf16.mxu0 %v2416_v14  ;;  %v2434_v26 = vld [vmem:[#allocation2 + $0xc4] ss:$16 sps:$4 sm:$0xff]   ;;  %v2436_v27 = vld [vmem:[#allocation2 + $0x1c0] ss:$16 sps:$4 sm:$0xff]   ;;  %v2461_v52 = vld [vmem:[#allocation2 + $0x1ac] ss:$16 sps:$4 sm:$0xff]  }
  0x54   : > { %v2437_v28 = vld [vmem:[#allocation2 + $0xc0] ss:$16 sps:$4 sm:$0xff]   ;;  %v2438_v29 = vld [vmem:[#allocation2 + $0x1e4] ss:$16 sps:$4 sm:$0xff]   ;;  %v2459_v56 = vld [vmem:[#allocation2 + $0x1a8] ss:$16 sps:$4 sm:$0xff]  }
  0x55   : > { %v2440_v30 = vld [vmem:[#allocation2 + $0xe4] ss:$16 sps:$4 sm:$0xff]   ;;  %v2442_v31 = vld [vmem:[#allocation2 + $0x1e0] ss:$16 sps:$4 sm:$0xff]   ;;  %v2464_v57 = vld [vmem:[#allocation2 + $0x1cc] ss:$16 sps:$4 sm:$0xff]  }
  0x56   : > { %812 = vmatpush1.bf16.msra.mxu1 %v2418_v15  ;;  %1054 = vmatpush1.bf16.msra.mxu0 %v2419_v16  ;;  %v2443_v32 = vld [vmem:[#allocation2 + $0xe0] ss:$16 sps:$4 sm:$0xff]   ;;  %v2494_v49 = vld [vmem:[#allocation4 + $0x4] ss:$8 sps:$4 sm:$0xff]   ;;  %v2497_v50 = vld [vmem:[#allocation4 + $0x14] ss:$8 sps:$4 sm:$0xff]  }
  0x57   : > { %813 = vmatprep.subr.bf16.mxu1 %v2420_v17  ;;  %1055 = vmatprep.subr.bf16.mxu0 %v2422_v18  ;;  %v2868_v33 = vld [vmem:[%s556_s22] sm:$0x3]  ;;  %v2318_v53 = vld [vmem:[%s3035_s12 + $0x4] sm:$0x3]  ;;  %v2495_v54 = vld [vmem:[#allocation4 + $0x10] ss:$8 sps:$4 sm:$0xff]   ;;  %s560_s22 = scalar_lea.vmem %s3025_s2, %s2858_s17 }
  0x58   : > { %v2870_v34 = vld [vmem:[%s552_s25] sm:$0x3]  ;;  %v2874_v36 = vpack.c.bf16 %v2868_v33, %v2868_v33  ;;  %v2500_v55 = vld [vmem:[#allocation4 + $0x24] ss:$8 sps:$4 sm:$0xff]   ;;  %v2503_v59 = vld [vmem:[#allocation4 + $0x34] ss:$8 sps:$4 sm:$0xff]   ;;  %s564_s25 = scalar_lea.vmem %s3026_s3, %s2858_s17 }
  0x59   : > { %v2878_v37 = vpack.c.bf16 %v2870_v34, %v2870_v34  ;;  %v1155_v46 = vld [vmem:[%s3035_s12] sm:$0x3]  ;;  %v2462_v60 = vld [vmem:[#allocation2 + $0x1c8] ss:$16 sps:$4 sm:$0xff]   ;;  %v2467_v61 = vld [vmem:[#allocation2 + $0x1ec] ss:$16 sps:$4 sm:$0xff]  }
  0x5a   : > { %814 = vmatpush1.bf16.msra.mxu1 %v2424_v19  ;;  %1056 = vmatpush1.bf16.msra.mxu0 %v2425_v20  ;;  %v1165_v47 = vld [vmem:[%s3036_s13] sm:$0x3]  ;;  %v2501_v62 = vld [vmem:[#allocation4 + $0x30] ss:$8 sps:$4 sm:$0xff]   ;;  %v2506_v1 = vld [vmem:[#allocation4 + $0x44] ss:$8 sps:$4 sm:$0xff]  }
  0x5b   : > { %815 = vmatprep.subr.bf16.mxu1 %v2426_v21  ;;  %1057 = vmatprep.subr.bf16.mxu0 %v2428_v22  ;;  %v2492_v48 = vld [vmem:[#allocation4] ss:$8 sps:$4 sm:$0xff]   ;;  %v2470_v2 = vld [vmem:[#allocation2 + $0xc] ss:$16 sps:$4 sm:$0xff]   ;;  %v2507_v7 = vld [vmem:[#allocation4 + $0x50] ss:$8 sps:$4 sm:$0xff]  }
  0x5c   : > { %1158 = vperm.xlu0 %2394, %v1155_v46   ;;  %v2498_v58 = vld [vmem:[#allocation4 + $0x20] ss:$8 sps:$4 sm:$0xff]   ;;  %v2509_v4 = vld [vmem:[#allocation4 + $0x54] ss:$8 sps:$4 sm:$0xff]   ;;  %v2512_v8 = vld [vmem:[#allocation4 + $0x64] ss:$8 sps:$4 sm:$0xff]  }
  0x5d   : > { %v2465_v63 = vld [vmem:[#allocation2 + $0x1e8] ss:$16 sps:$4 sm:$0xff]   ;;  %v2473_v6 = vld [vmem:[#allocation2 + $0x2c] ss:$16 sps:$4 sm:$0xff]   ;;  %s2169_s17 = sshll.u32 %s3051_s16, 3  ;;  %vm2024_vm12 = vcmask 48128  }
  0x5e   : > { %816 = vmatpush1.bf16.msra.mxu1 %v2430_v23  ;;  %1058 = vmatpush1.bf16.msra.mxu0 %v2431_v24  ;;  %v2504_v3 = vld [vmem:[#allocation4 + $0x40] ss:$8 sps:$4 sm:$0xff]   ;;  %v2476_v10 = vld [vmem:[#allocation2 + $0x4c] ss:$16 sps:$4 sm:$0xff]   ;;  %v2513_v15 = vld [vmem:[#allocation4 + $0x70] ss:$8 sps:$4 sm:$0xff]   ;;  %s568_s28 = scalar_lea.vmem %s3027_s4, %s2169_s17  ;;  %s572_s30 = scalar_lea.vmem %s3028_s5, %s2169_s17 }
  0x5f   : > { %817 = vmatprep.subr.bf16.mxu1 %v2432_v25  ;;  %1059 = vmatprep.subr.bf16.mxu0 %v2434_v26  ;;  %v2468_v5 = vld [vmem:[#allocation2 + $0x8] ss:$16 sps:$4 sm:$0xff]   ;;  %v2515_v12 = vld [vmem:[#allocation4 + $0x74] ss:$8 sps:$4 sm:$0xff]   ;;  %v2518_v16 = vld [vmem:[#allocation4 + $0x84] ss:$8 sps:$4 sm:$0xff]  }
  0x60   : > { %1168 = vperm.xlu0 %2394, %v1165_v47   ;;  %v2471_v9 = vld [vmem:[#allocation2 + $0x28] ss:$16 sps:$4 sm:$0xff]   ;;  %v2479_v14 = vld [vmem:[#allocation2 + $0x6c] ss:$16 sps:$4 sm:$0xff]   ;;  %v2300_v47 = vld [vmem:[%s3036_s13 + $0x2] sm:$0x3] }
  0x61   : > { %v2510_v11 = vld [vmem:[#allocation4 + $0x60] ss:$8 sps:$4 sm:$0xff]   ;;  %v2482_v18 = vld [vmem:[#allocation2 + $0x8c] ss:$16 sps:$4 sm:$0xff]   ;;  %v2519_v22 = vld [vmem:[#allocation4 + $0x90] ss:$8 sps:$4 sm:$0xff]  }
  0x62   : > { %818 = vmatpush1.bf16.msra.mxu1 %v2436_v27  ;;  %1060 = vmatpush1.bf16.msra.mxu0 %v2437_v28  ;;  %v2474_v13 = vld [vmem:[#allocation2 + $0x48] ss:$16 sps:$4 sm:$0xff]   ;;  %v2521_v20 = vld [vmem:[#allocation4 + $0x94] ss:$8 sps:$4 sm:$0xff]   ;;  %v2524_v23 = vld [vmem:[#allocation4 + $0xa4] ss:$8 sps:$4 sm:$0xff]  }
  0x63   : > { %819 = vmatprep.subr.bf16.mxu1 %v2438_v29  ;;  %1061 = vmatprep.subr.bf16.mxu0 %v2440_v30  ;;  %v2477_v17 = vld [vmem:[#allocation2 + $0x68] ss:$16 sps:$4 sm:$0xff]   ;;  %v2485_v21 = vld [vmem:[#allocation2 + $0xac] ss:$16 sps:$4 sm:$0xff]  }
  0x64   : > { %1874 = vperm.xlu0 %2394, %v2318_v53   ;;  %v2516_v19 = vld [vmem:[#allocation4 + $0x80] ss:$8 sps:$4 sm:$0xff]   ;;  %v2488_v25 = vld [vmem:[#allocation2 + $0xcc] ss:$16 sps:$4 sm:$0xff]   ;;  %v2525_v30 = vld [vmem:[#allocation4 + $0xb0] ss:$8 sps:$4 sm:$0xff]  }
  0x65   : > { %v2483_v24 = vld [vmem:[#allocation2 + $0xa8] ss:$16 sps:$4 sm:$0xff]   ;;  %v2527_v27 = vld [vmem:[#allocation4 + $0xb4] ss:$8 sps:$4 sm:$0xff]  }
  0x66   : > { %820 = vmatpush1.bf16.msra.mxu1 %v2442_v31  ;;  %1062 = vmatpush1.bf16.msra.mxu0 %v2443_v32  ;;  %v2522_v26 = vld [vmem:[#allocation4 + $0xa0] ss:$8 sps:$4 sm:$0xff]   ;;  %v2491_v29 = vld [vmem:[#allocation2 + $0xec] ss:$16 sps:$4 sm:$0xff]  }
  0x67   : > { %846 = vmatprep.subr.bf16.mxu1 %v2446_v35  ;;  %1587 = vmatprep.subr.bf16.mxu0 %v2494_v49  ;;  %v2486_v28 = vld [vmem:[#allocation2 + $0xc8] ss:$16 sps:$4 sm:$0xff]   ;;  %v2530_v32 = vld [vmem:[#allocation4 + $0xc4] ss:$8 sps:$4 sm:$0xff]   ;;  %v2592_v49 = vld [vmem:[%s3033_s10 + $0x50] sm:$0xff]  }
  0x68   : > { %v2489_v31 = vld [vmem:[#allocation2 + $0xe8] ss:$16 sps:$4 sm:$0xff]  }
  0x69   : > { %838 = vmatmul.mubr.bf16.vlgmr.msra.gmra.mrb[0].mxu1 %v2874_v36  ;;  %1080 = vmatmul.mubr.bf16.vlgmr.msra.gmra.mrb[0].mxu0 %v2878_v37  ;;  %v2528_v35 = vld [vmem:[#allocation4 + $0xc0] ss:$8 sps:$4 sm:$0xff]   ;;  %v2595_v53 = vld [vmem:[%s3033_s10 + $0x18] sm:$0xff]  }
  0x6a   : > { %847 = vmatpush1.bf16.msra.mxu1 %v2444_v38  ;;  %878 = vmatprep.mubr.bf16.mxu1 %v2688_v0  ;;  %v2531_v38 = vld [vmem:[#allocation4 + $0xd0] ss:$8 sps:$4 sm:$0xff]   ;;  %v2590_v46 = vld [vmem:[%s3033_s10 + $0x48] sm:$0xff]  }
  0x6b   : > { %848 = vmatprep.subr.bf16.mxu1 %v2449_v39  ;;  %1588 = vmatpush1.bf16.msra.mxu0 %v2492_v48  ;;  %v2536_v39 = vld [vmem:[#allocation4 + $0xe4] ss:$8 sps:$4 sm:$0xff]  }
  0x6c   : > { %1589 = vmatprep.subr.bf16.mxu0 %v2497_v50  ;;  %v2591_v48 = vld [vmem:[%s3033_s10 + $0x8] sm:$0xff]   ;;  %v2319_v50 = vld [vmem:[%s3036_s13 + $0x4] sm:$0x3] }
  0x6e   : > { %849 = vmatpush1.bf16.msra.mxu1 %v2447_v40  ;;  %v2534_v40 = vld [vmem:[#allocation4 + $0xe0] ss:$8 sps:$4 sm:$0xff]  }
  0x6f   : > { %850 = vmatprep.subr.bf16.mxu1 %v2452_v41  ;;  %1590 = vmatpush1.bf16.msra.mxu0 %v2495_v54  ;;  %v2537_v41 = vld [vmem:[#allocation4 + $0xf0] ss:$8 sps:$4 sm:$0xff]   ;;  %v2596_v54 = vld [vmem:[%s3033_s10 + $0x60] sm:$0xff]  }
  0x70   : > { %1591 = vmatprep.subr.bf16.mxu0 %v2500_v55  ;;  %v2597_v55 = vld [vmem:[%s3033_s10 + $0x20] sm:$0xff]  }
  0x72   : > { %851 = vmatpush1.bf16.msra.mxu1 %v2450_v42  ;;  %v2539_v42 = vld [vmem:[#allocation4 + $0xf4] ss:$8 sps:$4 sm:$0xff]  }
  0x73   : > { %852 = vmatprep.subr.bf16.mxu1 %v2455_v43  ;;  %1592 = vmatpush1.bf16.msra.mxu0 %v2498_v58  ;;  %v2542_v43 = vld [vmem:[#allocation4 + $0x104] ss:$8 sps:$4 sm:$0xff]  }
  0x74   : > { %1593 = vmatprep.subr.bf16.mxu0 %v2503_v59  ;;  %v2941_v59 = vld [vmem:[%s3030_s7] sm:$0xf] }
  0x76   : > { %853 = vmatpush1.bf16.msra.mxu1 %v2453_v44  ;;  %v2588_v44 = vld [vmem:[%s3033_s10 + $0x40] sm:$0xff]  }
  0x77   : > { %854 = vmatprep.subr.bf16.mxu1 %v2458_v45  ;;  %1594 = vmatpush1.bf16.msra.mxu0 %v2501_v62  ;;  %v2589_v45 = vld [vmem:[%s3033_s10] sm:$0xff]  }
  0x78   : > { %1595 = vmatprep.subr.bf16.mxu0 %v2506_v1 }
  0x7a   : > { %855 = vmatpush1.bf16.msra.mxu1 %v2456_v51  ;;  %v2593_v51 = vld [vmem:[%s3033_s10 + $0x10] sm:$0xff]  }
  0x7b   : > { %856 = vmatprep.subr.bf16.mxu1 %v2461_v52  ;;  %1596 = vmatpush1.bf16.msra.mxu0 %v2504_v3  ;;  %v2594_v52 = vld [vmem:[%s3033_s10 + $0x58] sm:$0xff]  }
  0x7c   : > { %1597 = vmatprep.subr.bf16.mxu0 %v2509_v4 }
  0x7e   : > { %857 = vmatpush1.bf16.msra.mxu1 %v2459_v56  ;;  %v1131_v56 = vlaneseq }
  0x7f   : > { %858 = vmatprep.subr.bf16.mxu1 %v2464_v57  ;;  %1598 = vmatpush1.bf16.msra.mxu0 %v2507_v7 }
  0x80   : > { %1599 = vmatprep.subr.bf16.mxu0 %v2512_v8  ;;  %v2935_v57 = vshrl.u32 %v1131_v56, 7 }
  0x82   : > { %859 = vmatpush1.bf16.msra.mxu1 %v2462_v60  ;;  %v1133_v58 = vsub.s32 0, %v2935_v57  ;;  %v1137_v60 = vsub.s32 1, %v2935_v57 }
  0x83   : > { %860 = vmatprep.subr.bf16.mxu1 %v2467_v61  ;;  %1600 = vmatpush1.bf16.msra.mxu0 %v2510_v11 }
  0x84   : > { %1601 = vmatprep.subr.bf16.mxu0 %v2515_v12  ;;  %v1134_v62 = vrot.slane %v2941_v59, %v1133_v58 }
  0x86   : > { %861 = vmatpush1.bf16.msra.mxu1 %v2465_v63 }
  0x87   : > { %1088 = vmatprep.subr.bf16.mxu1 %v2470_v2  ;;  %1602 = vmatpush1.bf16.msra.mxu0 %v2513_v15  ;;  %v1138_v2 = vrot.slane %v2941_v59, %v1137_v60 }
  0x88   : > { %1603 = vmatprep.subr.bf16.mxu0 %v2518_v16 }
  0x89   : > { %879 = vmatmul.mubr.bf16.vlgmr.msra.gmra.mrb[4].mxu1 %v2874_v36  ;;  %v2533_v36 = vld [vmem:[#allocation4 + $0xd4] ss:$8 sps:$4 sm:$0xff]  }
  0x8a   : > { %1089 = vmatpush1.bf16.msra.mxu1 %v2468_v5  ;;  %1120 = vmatprep.mubr.bf16.mxu1 %v2688_v0  ;;  %v2480_v0 = vld [vmem:[#allocation2 + $0x88] ss:$16 sps:$4 sm:$0xff]  }
  0x8b   : > { %1090 = vmatprep.subr.bf16.mxu1 %v2473_v6  ;;  %1604 = vmatpush1.bf16.msra.mxu0 %v2516_v19 }
  0x8c   : > { %1605 = vmatprep.subr.bf16.mxu0 %v2521_v20 }
  0x8e   : > { %1091 = vmatpush1.bf16.msra.mxu1 %v2471_v9 }
  0x8f   : > { %1092 = vmatprep.subr.bf16.mxu1 %v2476_v10  ;;  %1606 = vmatpush1.bf16.msra.mxu0 %v2519_v22  ;;  %v2540_v22 = vld [vmem:[#allocation4 + $0x100] ss:$8 sps:$4 sm:$0xff]  }
  0x90   : > { %1607 = vmatprep.subr.bf16.mxu0 %v2524_v23 }
  0x92   : > { %1093 = vmatpush1.bf16.msra.mxu1 %v2474_v13 }
  0x93   : > { %1094 = vmatprep.subr.bf16.mxu1 %v2479_v14  ;;  %1608 = vmatpush1.bf16.msra.mxu0 %v2522_v26  ;;  %v2548_v26 = vld [vmem:[#allocation4 + $0x124] ss:$8 sps:$4 sm:$0xff]  }
  0x94   : > { %1609 = vmatprep.subr.bf16.mxu0 %v2527_v27  ;;  %v2546_v27 = vld [vmem:[#allocation4 + $0x120] ss:$8 sps:$4 sm:$0xff]  }
  0x96   : > { %1095 = vmatpush1.bf16.msra.mxu1 %v2477_v17 }
  0x97   : > { %1096 = vmatprep.subr.bf16.mxu1 %v2482_v18  ;;  %1610 = vmatpush1.bf16.msra.mxu0 %v2525_v30  ;;  %v2554_v30 = vld [vmem:[#allocation4 + $0x144] ss:$8 sps:$4 sm:$0xff]  }
  0x98   : > { %1611 = vmatprep.subr.bf16.mxu0 %v2530_v32  ;;  %v2557_v32 = vld [vmem:[#allocation4 + $0x154] ss:$8 sps:$4 sm:$0xff]  }
  0x9a   : > { %1097 = vmatpush1.bf16.msra.mxu1 %v2480_v0 }
  0x9b   : > { %1098 = vmatprep.subr.bf16.mxu1 %v2485_v21  ;;  %1612 = vmatpush1.bf16.msra.mxu0 %v2528_v35 }
  0x9c   : > { %1613 = vmatprep.subr.bf16.mxu0 %v2533_v36 }
  0x9e   : > { %1099 = vmatpush1.bf16.msra.mxu1 %v2483_v24  ;;  %v2545_v24 = vld [vmem:[#allocation4 + $0x114] ss:$8 sps:$4 sm:$0xff]  }
  0x9f   : > { %1100 = vmatprep.subr.bf16.mxu1 %v2488_v25  ;;  %1614 = vmatpush1.bf16.msra.mxu0 %v2531_v38  ;;  %v2543_v25 = vld [vmem:[#allocation4 + $0x110] ss:$8 sps:$4 sm:$0xff]  }
  0xa0   : > { %1615 = vmatprep.subr.bf16.mxu0 %v2536_v39  ;;  %v2555_v38 = vld [vmem:[#allocation4 + $0x150] ss:$8 sps:$4 sm:$0xff]  }
  0xa2   : > { %1101 = vmatpush1.bf16.msra.mxu1 %v2486_v28  ;;  %v2551_v28 = vld [vmem:[#allocation4 + $0x134] ss:$8 sps:$4 sm:$0xff]  }
  0xa3   : > { %1102 = vmatprep.subr.bf16.mxu1 %v2491_v29  ;;  %1616 = vmatpush1.bf16.msra.mxu0 %v2534_v40  ;;  %v2549_v29 = vld [vmem:[#allocation4 + $0x130] ss:$8 sps:$4 sm:$0xff]   ;;  %v2560_v40 = vld [vmem:[#allocation4 + $0x164] ss:$8 sps:$4 sm:$0xff]  }
  0xa4   : > { %1617 = vmatprep.subr.bf16.mxu0 %v2539_v42  ;;  %v2558_v42 = vld [vmem:[#allocation4 + $0x160] ss:$8 sps:$4 sm:$0xff]  }
  0xa6   : > { %1103 = vmatpush1.bf16.msra.mxu1 %v2489_v31  ;;  %v2552_v31 = vld [vmem:[#allocation4 + $0x140] ss:$8 sps:$4 sm:$0xff]  }
  0xa7   : > { %1618 = vmatpush1.bf16.msra.mxu0 %v2537_v41  ;;  %2322 = vmatprep.subr.bf16.mxu1 %v2588_v44  ;;  %v2566_v44 = vld [vmem:[#allocation4 + $0x184] ss:$8 sps:$4 sm:$0xff]  }
  0xa8   : > { %1628 = vmatprep.subr.bf16.mxu0 %v2542_v43  ;;  %v2563_v43 = vld [vmem:[#allocation4 + $0x174] ss:$8 sps:$4 sm:$0xff]  }
  0xa9   : > { %1121 = vmatmul.mubr.bf16.vlgmr.msra.gmra.mrb[8].mxu1 %v2878_v37  ;;  %v2299_v37 = vld [vmem:[%s3035_s12 + $0x2] sm:$0x3] }
  0xaa   : > { %1673 = vperm.xlu1 %2395, %v2299_v37   ;;  %2323 = vmatpush3.bf16.msra.mxu1 %v2589_v45  ;;  %v2561_v37 = vld [vmem:[#allocation4 + $0x170] ss:$8 sps:$4 sm:$0xff]   ;;  %v2564_v45 = vld [vmem:[#allocation4 + $0x180] ss:$8 sps:$4 sm:$0xff]  }
  0xab   : > { %2324 = vmatprep.subr.bf16.mxu1 %v2590_v46  ;;  %v2569_v46 = vld [vmem:[#allocation4 + $0x194] ss:$8 sps:$4 sm:$0xff]  }
  0xae   : > { %1682 = vperm.xlu1 %2395, %v2300_v47   ;;  %2325 = vmatpush3.bf16.msra.mxu1 %v2591_v48  ;;  %v2567_v47 = vld [vmem:[#allocation4 + $0x190] ss:$8 sps:$4 sm:$0xff]   ;;  %v2572_v48 = vld [vmem:[#allocation4 + $0x1a4] ss:$8 sps:$4 sm:$0xff]  }
  0xaf   : > { %2326 = vmatprep.subr.bf16.mxu1 %v2592_v49  ;;  %v2570_v49 = vld [vmem:[#allocation4 + $0x1a0] ss:$8 sps:$4 sm:$0xff]  }
  0xb2   : > { %1882 = vperm.xlu1 %2395, %v2319_v50   ;;  %2327 = vmatpush3.bf16.msra.mxu1 %v2593_v51  ;;  %v2575_v50 = vld [vmem:[#allocation4 + $0x1b4] ss:$8 sps:$4 sm:$0xff]   ;;  %v2573_v51 = vld [vmem:[#allocation4 + $0x1b0] ss:$8 sps:$4 sm:$0xff]  }
  0xb3   : > { %2328 = vmatprep.subr.bf16.mxu1 %v2594_v52  ;;  %v2578_v52 = vld [vmem:[#allocation4 + $0x1c4] ss:$8 sps:$4 sm:$0xff]  }
  0xb6   : > { %2329 = vmatpush3.bf16.msra.mxu1 %v2595_v53  ;;  %v1141_v53 = vsub.s32 2, %v2935_v57 }
  0xb7   : > { %2330 = vmatprep.subr.bf16.mxu1 %v2596_v54  ;;  %v1145_v54 = vsub.s32 3, %v2935_v57 }
  0xba   : > { %2331 = vmatpush3.bf16.msra.mxu1 %v2597_v55  ;;  %v2576_v55 = vld [vmem:[#allocation4 + $0x1c0] ss:$8 sps:$4 sm:$0xff]  }
  0xdb   : > { %v2944_v61 = vpop.permute.xlu0 %1158 }
  0xdf   : > { %v2953_v14 = vpop.permute.xlu0 %1168 }
 0x13c   : > { %v839_v63 = vpop.f32.mrb[0].mxu1  ;;  %v1081_v1 = vpop.f32.mrb[0].mxu0 }
 0x13d   : > { %v1082_v3 = vadd.f32 %v1081_v1, %v839_v63  ;;  %v841_v4 = vpop.f32.mrb[1].mxu1  ;;  %v1083_v5 = vpop.f32.mrb[1].mxu0  ;;  %v1142_v63 = vrot.slane %v2941_v59, %v1141_v53  ;;  %v1887_v53 = vand.u32 127, %v1131_v56 }
 0x13e   : > { %v1084_v6 = vadd.f32 %v1083_v5, %v841_v4  ;;  %v843_v7 = vpop.f32.mrb[2].mxu1  ;;  %v1085_v8 = vpop.f32.mrb[2].mxu0  ;;  %v2579_v5 = vld [vmem:[#allocation4 + $0x1d0] ss:$8 sps:$4 sm:$0xff]  }
 0x13f   : > { %v1151_v9 = vadd.f32 %v1134_v62, %v1082_v3  ;;  %v844_v10 = vpop.f32.mrb[3].mxu1  ;;  %v1086_v11 = vpop.f32.mrb[3].mxu0  ;;  %v2581_v62 = vld [vmem:[#allocation4 + $0x1d4] ss:$8 sps:$4 sm:$0xff]   ;;  %v2584_v8 = vld [vmem:[#allocation4 + $0x1e4] ss:$8 sps:$4 sm:$0xff]  }
 0x140   : > { %v1152_v12 = vadd.f32 %v1138_v2, %v1084_v6  ;;  %v1146_v2 = vrot.slane %v2941_v59, %v1145_v54  ;;  %vm1888_vm6 = vcmp.lt.s32.totalorder %v1887_v53, 100 }
 0x141   : > { %v1161_v13 = vmul.f32 %v2944_v61, %v1151_v9 }
 0x142   : > { %v1162_v15 = vmul.f32 %v2944_v61, %v1152_v12 }
 0x143   : > { %v1171_v16 = vadd.f32 %v2953_v14, %v1161_v13  ;;  %v2582_v13 = vld [vmem:[#allocation4 + $0x1e0] ss:$8 sps:$4 sm:$0xff]  }
 0x144   : > { %v1172_v17 = vadd.f32 %v2953_v14, %v1162_v15 }
 0x145   : > { %v1179_v18 = vmul.f32 0.01, %v1171_v16  ;;  %vm1175_vm0 = vcmp.ge.f32.partialorder %v1171_v16, 0.0 }
 0x146   : > { %vm1176_vm1 = vcmp.ge.f32.partialorder %v1172_v17, 0.0  ;;  %v1180_v19 = vmul.f32 0.01, %v1172_v17 }
 0x147   : > { %v1183_v20 = vsel %vm1175_vm0, %v1171_v16, %v1179_v18  ;;  %v2587_v16 = vld [vmem:[#allocation4 + $0x1f4] ss:$8 sps:$4 sm:$0xff]  }
 0x148   : > { %v1184_v0 = vsel %vm1176_vm1, %v1172_v17, %v1180_v19  ;;  %v1187_v23 = vpack.c.bf16 %v1183_v20, %v1183_v20  ;;  %v2585_v19 = vld [vmem:[#allocation4 + $0x1f0] ss:$8 sps:$4 sm:$0xff]  }
 0x149   : > { %v1188_v21 = vpack.c.bf16 %v1184_v0, %v1184_v0 }
 0x14b   : > { %1619 = vmatprep.mubr.bf16.mxu0 %v1188_v21 }
 0x14c   : > { %1620 = vmatmul.mubr.bf16.vlgmr.msra.gmra.mrb[4].mxu0 %v1187_v23 }
 0x14d   : > { %1629 = vmatpush1.bf16.msra.mxu0 %v2540_v22 }
 0x14e   : > { %1630 = vmatprep.subr.bf16.mxu0 %v2545_v24  ;;  %v2600_v24 = vld [vmem:[%s3033_s10 + $0x70] sm:$0xff]  }
 0x151   : > { %1631 = vmatpush1.bf16.msra.mxu0 %v2543_v25  ;;  %v2601_v25 = vld [vmem:[%s3033_s10 + $0x30] sm:$0xff]  }
 0x152   : > { %1632 = vmatprep.subr.bf16.mxu0 %v2548_v26  ;;  %v2602_v26 = vld [vmem:[%s3033_s10 + $0x78] sm:$0xff]  }
 0x155   : > { %1633 = vmatpush1.bf16.msra.mxu0 %v2546_v27  ;;  %v2603_v27 = vld [vmem:[%s3033_s10 + $0x38] sm:$0xff]  }
 0x156   : > { %1634 = vmatprep.subr.bf16.mxu0 %v2551_v28  ;;  %v1255_v28 = vld [vmem:[%s3032_s9] sm:$0x3] }
 0x159   : > { %1635 = vmatpush1.bf16.msra.mxu0 %v2549_v29  ;;  %v1260_v29 = vrot.slane %v1255_v28, %v1133_v58 }
 0x15a   : > { %1636 = vmatprep.subr.bf16.mxu0 %v2554_v30  ;;  %v1674_v30 = vpop.permute.xlu1 %1673 }
 0x15c   : > { %v880_v35 = vpop.f32.mrb[4].mxu1 }
 0x15d   : > { %v882_v36 = vpop.f32.mrb[5].mxu1  ;;  %1637 = vmatpush1.bf16.msra.mxu0 %v2552_v31  ;;  %v1264_v31 = vrot.slane %v1255_v28, %v1137_v60 }
 0x15e   : > { %v884_v39 = vpop.f32.mrb[6].mxu1  ;;  %1638 = vmatprep.subr.bf16.mxu0 %v2557_v32 }
 0x15f   : > { %v885_v41 = vpop.f32.mrb[7].mxu1 }
 0x161   : > { %1639 = vmatpush1.bf16.msra.mxu0 %v2555_v38 }
 0x162   : > { %1640 = vmatprep.subr.bf16.mxu0 %v2560_v40 }
 0x165   : > { %1641 = vmatpush1.bf16.msra.mxu0 %v2558_v42  ;;  %v1683_v42 = vpop.permute.xlu1 %1682 }
 0x166   : > { %1642 = vmatprep.subr.bf16.mxu0 %v2563_v43 }
 0x169   : > { %1643 = vmatpush1.bf16.msra.mxu0 %v2561_v37 }
 0x16a   : > { %1644 = vmatprep.subr.bf16.mxu0 %v2566_v44 }
 0x16d   : > { %1645 = vmatpush1.bf16.msra.mxu0 %v2564_v45 }
 0x16e   : > { %1646 = vmatprep.subr.bf16.mxu0 %v2569_v46 }
 0x171   : > { %1647 = vmatpush1.bf16.msra.mxu0 %v2567_v47 }
 0x172   : > { %1648 = vmatprep.subr.bf16.mxu0 %v2572_v48 }
 0x175   : > { %1649 = vmatpush1.bf16.msra.mxu0 %v2570_v49  ;;  %v2301_v49 = vld [vmem:[%s3034_s11] ss:$0 sm:$0xff] }
 0x176   : > { %1650 = vmatprep.subr.bf16.mxu0 %v2575_v50 }
 0x179   : > { %1651 = vmatpush1.bf16.msra.mxu0 %v2573_v51 }
 0x17a   : > { %1652 = vmatprep.subr.bf16.mxu0 %v2578_v52 }
 0x17c   : > { %v1122_v1 = vpop.f32.mrb[8].mxu1 }
 0x17d   : > { %v1123_v3 = vadd.f32 %v1122_v1, %v880_v35  ;;  %v1124_v4 = vpop.f32.mrb[9].mxu1  ;;  %1653 = vmatpush1.bf16.msra.mxu0 %v2576_v55  ;;  %v1883_v1 = vpop.permute.xlu1 %1882 }
 0x17e   : > { %v1125_v6 = vadd.f32 %v1124_v4, %v882_v36  ;;  %v1126_v7 = vpop.f32.mrb[10].mxu1  ;;  %1654 = vmatprep.subr.bf16.mxu0 %v2581_v62  ;;  %v1875_v62 = vpop.permute.xlu0 %1874 }
 0x17f   : > { %v1153_v9 = vadd.f32 %v1142_v63, %v1123_v3  ;;  %v1127_v10 = vpop.f32.mrb[11].mxu1 }
 0x180   : > { %v1154_v11 = vadd.f32 %v1146_v2, %v1125_v6  ;;  %v1904_v10 = vld [vmem:[%s560_s22] sm:$0x3] }
 0x181   : > { %v1163_v12 = vmul.f32 %v2944_v61, %v1153_v9  ;;  %1655 = vmatpush1.bf16.msra.mxu0 %v2579_v5 }
 0x182   : > { %v1164_v15 = vmul.f32 %v2944_v61, %v1154_v11  ;;  %1656 = vmatprep.subr.bf16.mxu0 %v2584_v8  ;;  %v2598_v61 = vld [vmem:[%s3033_s10 + $0x68] sm:$0xff]  }
 0x183   : > { %v1173_v59 = vadd.f32 %v2953_v14, %v1163_v12  ;;  %2332 = vmatprep.subr.bf16.mxu1 %v2598_v61  ;;  %v1906_v12 = vld [vmem:[%s564_s25] sm:$0x3] }
 0x184   : > { %v1174_v17 = vadd.f32 %v2953_v14, %v1164_v15  ;;  %v2599_v14 = vld [vmem:[%s3033_s10 + $0x28] sm:$0xff]  }
 0x185   : > { %v1181_v18 = vmul.f32 0.01, %v1173_v59  ;;  %1657 = vmatpush1.bf16.msra.mxu0 %v2582_v13  ;;  %vm1177_vm2 = vcmp.ge.f32.partialorder %v1173_v59, 0.0  ;;  %2333 = vmatpush3.bf16.msra.mxu1 %v2599_v14 }
 0x186   : > { %1658 = vmatprep.subr.bf16.mxu0 %v2587_v16  ;;  %vm1178_vm3 = vcmp.ge.f32.partialorder %v1174_v17, 0.0  ;;  %v1182_v20 = vmul.f32 0.01, %v1174_v17  ;;  %2334 = vmatprep.subr.bf16.mxu1 %v2600_v24 }
 0x187   : > { %v1185_v0 = vsel %vm1177_vm2, %v1173_v59, %v1181_v18 }
 0x188   : > { %v1186_v21 = vsel %vm1178_vm3, %v1174_v17, %v1182_v20  ;;  %v1189_v23 = vpack.c.bf16 %v1185_v0, %v1185_v0  ;;  %v2689_v0 = vmov 0.0  }
 0x189   : > { %1659 = vmatpush1.bf16.msra.mxu0 %v2585_v19  ;;  %v1190_v22 = vpack.c.bf16 %v1186_v21, %v1186_v21  ;;  %2335 = vmatpush3.bf16.msra.mxu1 %v2601_v25 }
 0x18a   : > { %2336 = vmatprep.subr.bf16.mxu1 %v2602_v26 }
 0x18b   : > { %1660 = vmatprep.mubr.bf16.mxu0 %v1190_v22 }
 0x18c   : > { %1661 = vmatmul.mubr.bf16.vlgmr.msra.gmra.mrb[4].mxu0 %v1189_v23 }
 0x18d   : > { %2337 = vmatpush3.bf16.msra.mxu1 %v2603_v27 }
 0x18e   : > { %2346 = vmatprep.subr.mxu1 %v2689_v0 }
 0x25f   : > { %v1662_v32 = vpop.f32.mrb[4].mxu0 }
 0x260   : > { %v2351_v35 = vadd.f32 %v1662_v32, %v1260_v29  ;;  %v1664_v36 = vpop.f32.mrb[5].mxu0 }
 0x261   : > { %v2352_v38 = vadd.f32 %v1664_v36, %v1264_v31  ;;  %v1666_v39 = vpop.f32.mrb[6].mxu0 }
 0x262   : > { %v1676_v40 = vmul.f32 %v2351_v35, %v1674_v30  ;;  %v1667_v41 = vpop.f32.mrb[7].mxu0 }
 0x263   : > { %v1677_v43 = vmul.f32 %v2352_v38, %v1674_v30 }
 0x264   : > { %v1685_v37 = vadd.f32 %v1683_v42, %v1676_v40 }
 0x265   : > { %v1686_v44 = vadd.f32 %v1683_v42, %v1677_v43  ;;  %v1941_v43 = vld [vmem:[%s568_s28] sm:$0x3f] }
 0x266   : > { %vm1687_vm4 = vcmp.ge.f32.partialorder %v1685_v37, 0.0  ;;  %v1689_v45 = vmul.f32 0.01, %v1685_v37 }
 0x267   : > { %vm1688_vm5 = vcmp.ge.f32.partialorder %v1686_v44, 0.0  ;;  %v1690_v46 = vmul.f32 0.01, %v1686_v44 }
 0x268   : > { %v1691_v58 = vsel %vm1687_vm4, %v1685_v37, %v1689_v45 }
 0x269   : > { %v1692_v47 = vsel %vm1688_vm5, %v1686_v44, %v1690_v46  ;;  %v1693_v57 = vpack.c.bf16 %v1691_v58, %v1691_v58  ;;  %v1943_v44 = vld [vmem:[%s572_s30] sm:$0x3f] }
 0x26a   : > { %v1694_v48 = vpack.c.bf16 %v1692_v47, %v1692_v47  ;;  %v2691_v47 = vmov 1.0  }
 0x26c   : > { %1862 = vmatprep.mubr.bf16.mxu1 %v1694_v48 }
 0x26d   : > { %1863 = vmatmul.mubr.bf16.vlgmr.msra.gmra.mrb[12].mxu1 %v1693_v57 }
 0x26e   : > { %2348 = vmatprep.mubr.msk.f32.mxu1 %vm2690_vm8, %v2689_v0 }
 0x340   : > { %v2338_v60 = vpop.f32.mrb[12].mxu1 }
 0x341   : > { %v2339_v50 = vpop.f32.mrb[13].mxu1 }
 0x342   : > { %v2340_v51 = vadd.f32 %v2339_v50, %v2338_v60  ;;  %v2341_v52 = vpop.f32.mrb[14].mxu1 }
 0x343   : > { %v2342_v54 = vpop.f32.mrb[15].mxu1 }
 0x344   : > { %v1865_v55 = vadd.f32 %v2340_v51, %v2301_v49 }
 0x346   : > { %v1877_v63 = vmul.f32 %v1875_v62, %v1865_v55 }
 0x348   : > { %v1885_v2 = vadd.f32 %v1883_v1, %v1877_v63 }
 0x34a   : > { %v1891_v3 = vsel %vm1888_vm6, %v1885_v2, 0.0 }
 0x34b   : > { %v1893_v4 = vsel %vm1892_vm7, %v1891_v3, 0.0 }
 0x34c   : > { %v1894_v5 = vrot.slane %v1893_v4, 4 }
 0x34e   : > { %v1895_v6 = vadd.f32 %v1894_v5, %v1893_v4 }
 0x350   : > { %v1896_v7 = vrot.slane %v1895_v6, 2 }
 0x352   : > { %v1897_v8 = vadd.f32 %v1896_v7, %v1895_v6 }
 0x354   : > { %v1898_v56 = vrot.slane %v1897_v8, 1 }
 0x356   : > { %v1899_v9 = vadd.f32 %v1898_v56, %v1897_v8 }
 0x358   : > { %v1901_v11 = vmul.f32 0.5, %v1899_v9 }
 0x35a   : > { %v1905_v13 = vadd.f32 %v1904_v10, %v1901_v11  ;;  %v1902_v15 = vadd.f32 %v1901_v11, %v2870_v34 }
 0x35c   : > { %v1907_v16 = vsub.f32 %v1905_v13, %v1906_v12  ;;  %v1903_v59 = vsub.f32 %v1902_v15, %v2868_v33 }
 0x35e   : > { %v1912_v17 = vmul.f32 %v1907_v16, %v1907_v16  ;;  %v1908_v18 = vmul.f32 %v1903_v59, %v1903_v59 }
 0x360   : > { %v1913_v19 = vsel %vm1892_vm7, %v1912_v17, 0.0  ;;  %v1909_v20 = vsel %vm1892_vm7, %v1908_v18, 0.0 }
 0x361   : > { %1914 = vadd.xlane.f32.xlu1 %v1913_v19  ;;  %1910 = vadd.xlane.f32.xlu0 %v1909_v20 }
 0x3ee   : > { %v1915_v21 = vpop.xlane.xlu1 %1914  ;;  %v1911_v22 = vpop.xlane.xlu0 %1910 }
 0x3ef   : > { %v1918_v23 = vmax.f32 %v1915_v21, 1e-30  ;;  %v1916_v61 = vmax.f32 %v1911_v22, 1e-30 }
 0x3f1   : > { %2604 = vrsqrt.f32 %v1918_v23 }
 0x3f2   : > { %2606 = vrsqrt.f32 %v1916_v61 }
 0x3fb   : > { %v2605_v34 = vpop.eup %2604 }
 0x3fc   : > { %v2607_v33 = vpop.eup %2606  ;;  %v1926_v24 = vmul.f32 %v2605_v34, %v1907_v16  ;;  %v1921_v26 = vmul.f32 %v2605_v34, %v1915_v21 }
 0x3fd   : > { %v1920_v14 = vmul.f32 %v2607_v33, %v1911_v22  ;;  %v1925_v25 = vmul.f32 %v2607_v33, %v1903_v59 }
 0x3ff   : > { %v1922_v27 = vadd.f32 1.0, %v1920_v14  ;;  %v1927_v29 = vsub.f32 %v1925_v25, %v1926_v24 }
 0x401   : > { %v1923_v28 = vsub.f32 %v1922_v27, %v1921_v26 }
 0x403   : > { %vm1924_vm9 = vcmp.gt.f32.partialorder %v1923_v28, 0.0 }
 0x404   : > { %v1930_v30 = vsel %vm1924_vm9, %v1927_v29, 0.0 }
 0x405   : > { %v1931_v31 = vsel %vm1892_vm7, %v1930_v30, 0.0 }
 0x406   : > { %v1932_v32 = vrot.slane %v1931_v31, 4 }
 0x408   : > { %v1933_v35 = vadd.f32 %v1932_v32, %v1931_v31 }
 0x40a   : > { %v1934_v36 = vrot.slane %v1933_v35, 2 }
 0x40c   : > { %v1935_v38 = vadd.f32 %v1934_v36, %v1933_v35 }
 0x40e   : > { %v1936_v39 = vrot.slane %v1935_v38, 1 }
 0x410   : > { %v1937_v40 = vadd.f32 %v1936_v39, %v1935_v38 }
 0x412   : > { %v1938_v41 = vmul.f32 0.25, %v1937_v40 }
 0x414   : > { %v1939_v42 = vmul.f32 5.0, %v1938_v41 }
 0x416   : > { %v1940_v37 = vsub.f32 %v1901_v11, %v1939_v42 }
 0x418   : > { %v1942_v45 = vadd.f32 %v1941_v43, %v1940_v37 }
 0x41a   : > { %v1944_v46 = vsub.f32 %v1942_v45, %v1943_v44 }
 0x41c   : > { %v1945_v58 = vmul.f32 %v1944_v46, %v1944_v46 }
 0x41e   : > { %2347 = vmatpush3.xpose.msra.mxu1 %v1945_v58 }
 0x421   : > { %2349 = vmatmul.mubr.f32.vlgmr.msra.gmra.mrb[16].mxu1 %v2691_v47 }
 0x4f4   : > { %v2012_v48 = vpop.f32.mrb[16].mxu1 }
 0x4f5   : > { %2608 = vrsqrt.f32 %v2012_v48  ;;  %v2350_v57 = vpop.f32.mrb[17].mxu1  ;;  %vm2018_vm10 = vcmp.eq.f32.partialorder %v2012_v48, inf  ;;  %v2021_v50 = vand.u32 2147483648, %v2012_v48  ;;  %vm2020_vm11 = vcmp.eq.f32.partialorder %v2012_v48, 0.0 }
 0x4ff   : > { %v2609_v60 = vpop.eup %2608 }
 0x500   : > { %v2017_v49 = vmul.f32 %v2609_v60, %v2012_v48 }
 0x502   : > { %v2019_v51 = vsel %vm2018_vm10, %v2012_v48, %v2017_v49 }
 0x503   : > { %v2022_v52 = vsel %vm2020_vm11, %v2021_v50, %v2019_v51 }
 0x504   : > { %v2023_v53 = vsub.f32 0.0, %v2022_v52 }
 0x506   : > { %v2025_v54 = vsel %vm2024_vm12, %v2023_v53, 0.0 }
 0x507   : > { %2026 = vst [vmem:[%s575_s19] sm:$0x1] %v2025_v54 }
 0x508 PF: > { %s3049_s20 = sld [smem:[#allocation8_spill]] }
 0x50e   : > { %s26_s29 = sadd.s32 1, %s3049_s20  }
 0x50f   : > { %p23_p9 = scmp.ge.s32.totalorder %s26_s29, 4  }
 0x511   :  { %25 = sbr.rel (!%p23_p9) target bundleno = 2 (0x2), region = 134 }
 0x518   :  { %2044 = vsyncpa [#allocation3], 1 }
 0x519   :  { %2046 = vsyncpa [#allocation3 + $0x1], 1 }
 0x51a   :  { %2047 = vsyncpa [#allocation5], 1 }

</bundles_post_ra>
